<compile_context>
chip_gen: v7x
topology: tpu7x:2x2x1
jax: 0.10.0
libtpu: 0.0.40
codegen_flags: <defaults>
</compile_context>

<pallas_src>
import math
import functools

import jax
import jax.numpy as jnp
from jax import lax
from jax.experimental import pallas as pl
from jax.experimental.pallas import tpu as pltpu


_INV_SQRT2 = 1.0 / math.sqrt(2.0)


def _round_up(x: int, m: int) -> int:
    return (x + m - 1) // m * m


def _gelu_exact_f32(y):
    # gelu(x) = x * Phi(x), Phi = standard normal CDF = 0.5*(1 + erf(x/sqrt(2)))
    return 0.5 * (1.0 + lax.erf(y * _INV_SQRT2)) * y


def _gelu_tanh_f32(y):
    # EUP-friendly tanh approximation (frees VALU slots when VPU-bound).
    c = math.sqrt(2.0 / math.pi)
    return 0.5 * y * (1.0 + jnp.tanh(c * (y + 0.044715 * y * y * y)))


# ----------------------------------------------------------------------------
# Kernel: one row tile through the entire MLP.
# ----------------------------------------------------------------------------
def _fused_rff_kernel(x_ref, *refs, n_layers: int, approx_gelu: bool):
    """refs = (w_0, b_0, w_1, b_1, ..., w_{L-1}, b_{L-1}, o_ref).

    Weights are (in, out) in the compute dtype (bf16 by default); biases are
    (1, out) f32. Each matmul accumulates in f32 on the MXU; GELU runs in f32.
    """
    o_ref = refs[-1]
    gelu = _gelu_tanh_f32 if approx_gelu else _gelu_exact_f32
    compute_dtype = x_ref.dtype

    h = x_ref[...]                                       # (tm, in_dim)
    for li in range(n_layers):
        w = refs[2 * li][...]                            # (in, out) compute dtype
        b = refs[2 * li + 1][...]                        # (1, out)  f32
        y = jnp.dot(h, w, preferred_element_type=jnp.float32) + b
        if li != n_layers - 1:
            h = gelu(y).astype(compute_dtype)            # back to MXU dtype
        else:
            o_ref[...] = y.astype(o_ref.dtype)


def _vmem_limit_bytes(tm, layer_dims, compute_dtype):
    isz = jnp.dtype(compute_dtype).itemsize
    w_bytes = sum(fi * fo for fi, fo in layer_dims) * isz
    b_bytes = sum(fo for _, fo in layer_dims) * 4
    x_bytes = tm * layer_dims[0][0] * isz
    o_bytes = tm * layer_dims[-1][1] * 4
    widest = max(fo for _, fo in layer_dims)
    act_bytes = tm * widest * (4 + isz)                  # f32 pre-GELU + bf16 copy
    need = 2 * (x_bytes + o_bytes) + 2 * (w_bytes + b_bytes) + 2 * act_bytes
    need += 4 << 20                                      # headroom
    # Floor at the 32 MiB default scope, cap at v7x's 64 MiB physical VMEM.
    return int(min(max(need, 32 << 20), 64 << 20))


# ----------------------------------------------------------------------------
# Wrapper: flatten rows, pad ragged tail, launch one fused pallas_call.
# ----------------------------------------------------------------------------
def rff_forward(x, params, *, tm: int = 256,
                compute_dtype=jnp.bfloat16, approx_gelu: bool = False):
    """x: (..., input_dim). params: list of (W (in,out), b (out,)) in f32."""
    lead_shape = x.shape[:-1]
    in_dim = x.shape[-1]
    out_dim = params[-1][0].shape[1]
    n_layers = len(params)

    x2d = x.reshape(-1, in_dim)
    M = x2d.shape[0]

    # Row tile: multiple of 16 (bf16 sublane packing), large enough for the
    # MXU, but never (much) bigger than the padded row count.
    tm = max(16, min(_round_up(tm, 16), _round_up(M, 16)))
    M_pad = _round_up(M, tm)

    x2d = x2d.astype(compute_dtype)
    if M_pad != M:
        x2d = jnp.pad(x2d, ((0, M_pad - M), (0, 0)))

    ws = [w.astype(compute_dtype) for w, _ in params]
    bs = [b.reshape(1, -1).astype(jnp.float32) for _, b in params]
    layer_dims = [(w.shape[0], w.shape[1]) for w, _ in params]

    in_specs = [pl.BlockSpec((tm, in_dim), lambda i: (i, 0))]   # row tile of x
    operands = [x2d]
    for w, b in zip(ws, bs):
        in_specs.append(pl.BlockSpec(w.shape, lambda i: (0, 0)))   # resident weight
        in_specs.append(pl.BlockSpec(b.shape, lambda i: (0, 0)))   # resident bias
        operands.append(w)
        operands.append(b)

    kernel = functools.partial(_fused_rff_kernel,
                               n_layers=n_layers, approx_gelu=approx_gelu)

    out = pl.pallas_call(
        kernel,
        out_shape=jax.ShapeDtypeStruct((M_pad, out_dim), jnp.float32),
        grid_spec=pltpu.PrefetchScalarGridSpec(
            num_scalar_prefetch=0,
            grid=(M_pad // tm,),
            in_specs=in_specs,
            out_specs=pl.BlockSpec((tm, out_dim), lambda i: (i, 0)),
        ),
        compiler_params=pltpu.CompilerParams(
            dimension_semantics=("parallel",),
            vmem_limit_bytes=_vmem_limit_bytes(tm, layer_dims, compute_dtype),
        ),
    )(*operands)

    if M_pad != M:
        out = out[:M]
    return out.reshape(*lead_shape, out_dim)


# ----------------------------------------------------------------------------
# Parameter init mirroring nn.Linear's U(-1/sqrt(fan_in), 1/sqrt(fan_in)).
# Weights stored as (in, out) so the kernel computes y = x @ W + b.
# ----------------------------------------------------------------------------
def init_rff_params(key, input_dim: int, hidden_layers: int):
    dims = [(input_dim, 4 * input_dim)]
    dims += [(4 * input_dim, 4 * input_dim) for _ in range(hidden_layers)]
    dims += [(4 * input_dim, input_dim)]
    params = []
    for fan_in, fan_out in dims:
        key, kw, kb = jax.random.split(key, 3)
        bound = 1.0 / math.sqrt(fan_in)
        w = jax.random.uniform(kw, (fan_in, fan_out), jnp.float32, -bound, bound)
        b = jax.random.uniform(kb, (fan_out,), jnp.float32, -bound, bound)
        params.append((w, b))
    return params


# ----------------------------------------------------------------------------
# Pure-JAX references.
# ----------------------------------------------------------------------------
def rff_reference_matched(x, params, *, compute_dtype=jnp.bfloat16,
                          approx_gelu: bool = False):
    """Mirrors the kernel's compute path (bf16 matmuls, f32 accum/GELU)."""
    gelu = _gelu_tanh_f32 if approx_gelu else _gelu_exact_f32
    h = x.reshape(-1, x.shape[-1]).astype(compute_dtype)
    n = len(params)
    for li, (w, b) in enumerate(params):
        y = jnp.dot(h, w.astype(compute_dtype),
                    preferred_element_type=jnp.float32) + b.astype(jnp.float32)
        if li != n - 1:
            h = gelu(y).astype(compute_dtype)
        else:
            h = y
    return h.reshape(*x.shape[:-1], params[-1][0].shape[1])


def rff_reference_f32(x, params):
    """Full-precision reference of the original module semantics."""
    h = x.reshape(-1, x.shape[-1]).astype(jnp.float32)
    n = len(params)
    for li, (w, b) in enumerate(params):
        h = h @ w + b
        if li != n - 1:
            h = _gelu_exact_f32(h)
    return h.reshape(*x.shape[:-1], params[-1][0].shape[1])


if __name__ == "__main__":
    key = jax.random.PRNGKey(0)
    input_dim, hidden_layers = 32, 1
    k_x1, k_x2, k_p = jax.random.split(key, 3)
    params = init_rff_params(k_p, input_dim, hidden_layers)

    # Case 1: small aligned shape.
    x1 = jax.random.normal(k_x1, (2, 8, input_dim), jnp.float32)
    out1 = jax.block_until_ready(rff_forward(x1, params))
    assert out1.shape == (2, 8, input_dim)
    ref1 = rff_reference_matched(x1, params)
    assert jnp.allclose(out1, ref1, atol=2e-2, rtol=2e-2), "mismatch vs bf16 ref (1)"
    assert jnp.allclose(out1, rff_reference_f32(x1, params), atol=1e-1, rtol=1e-1), \
        "mismatch vs f32 ref (1)"

    # Case 2: ragged row count (exercises wrapper-side padding of the row tile).
    x2 = jax.random.normal(k_x2, (3, 7, input_dim), jnp.float32)
    out2 = jax.block_until_ready(rff_forward(x2, params))
    assert out2.shape == (3, 7, input_dim)
    ref2 = rff_reference_matched(x2, params)
    assert jnp.allclose(out2, ref2, atol=2e-2, rtol=2e-2), "mismatch vs bf16 ref (2)"

    print("KERNEL_OK")
</pallas_src>

<mosaic_0001>
module attributes {stable_mosaic.version = 11 : i64} {
  func.func @_fused_rff_kernel(%arg0: i32, %arg1: memref<16x32xbf16, #tpu.memory_space<vmem>>, %arg2: memref<32x128xbf16, #tpu.memory_space<vmem>>, %arg3: memref<1x128xf32, #tpu.memory_space<vmem>>, %arg4: memref<128x128xbf16, #tpu.memory_space<vmem>>, %arg5: memref<1x128xf32, #tpu.memory_space<vmem>>, %arg6: memref<128x32xbf16, #tpu.memory_space<vmem>>, %arg7: memref<1x32xf32, #tpu.memory_space<vmem>>, %arg8: memref<16x32xf32, #tpu.memory_space<vmem>>) attributes {dimension_semantics = [#tpu.dimension_semantics<parallel>], iteration_bounds = array<i64: 1>, scalar_prefetch = 0 : i64, scratch_operands = 0 : i64, tpu.core_type = #tpu.core_type<tc>, window_params = [{transform_indices = @transform_0, window_bounds = array<i64: 16, 32>}, {pipeline_mode = #tpu.pipeline_mode<synchronous>, transform_indices = @transform_1, window_bounds = array<i64: 32, 128>}, {pipeline_mode = #tpu.pipeline_mode<synchronous>, transform_indices = @transform_2, window_bounds = array<i64: 1, 128>}, {pipeline_mode = #tpu.pipeline_mode<synchronous>, transform_indices = @transform_3, window_bounds = array<i64: 128, 128>}, {pipeline_mode = #tpu.pipeline_mode<synchronous>, transform_indices = @transform_4, window_bounds = array<i64: 1, 128>}, {pipeline_mode = #tpu.pipeline_mode<synchronous>, transform_indices = @transform_5, window_bounds = array<i64: 128, 32>}, {pipeline_mode = #tpu.pipeline_mode<synchronous>, transform_indices = @transform_6, window_bounds = array<i64: 1, 32>}, {transform_indices = @transform_7, window_bounds = array<i64: 16, 32>}]} {
    %c0 = arith.constant 0 : index
    %c0_0 = arith.constant 0 : index
    %0 = vector.load %arg1[%c0, %c0_0] : memref<16x32xbf16, #tpu.memory_space<vmem>>, vector<16x32xbf16>
    %c0_1 = arith.constant 0 : index
    %c0_2 = arith.constant 0 : index
    %1 = vector.load %arg2[%c0_1, %c0_2] : memref<32x128xbf16, #tpu.memory_space<vmem>>, vector<32x128xbf16>
    %c0_3 = arith.constant 0 : index
    %c0_4 = arith.constant 0 : index
    %2 = vector.load %arg3[%c0_3, %c0_4] : memref<1x128xf32, #tpu.memory_space<vmem>>, vector<1x128xf32>
    %cst = arith.constant dense<0.000000e+00> : vector<16x128xf32>
    %3 = tpu.matmul %0, %1, %cst {dimension_numbers = #tpu.dot_dimension_numbers<[1], [0], [0], [1], [0, 0, 1, 1], [], []>} : vector<16x32xbf16>, vector<32x128xbf16>, vector<16x128xf32> -> vector<16x128xf32>
    %4 = vector.broadcast %2 : vector<1x128xf32> to vector<16x128xf32>
    %5 = arith.addf %3, %4 : vector<16x128xf32>
    %cst_5 = arith.constant 0.707106769 : f32
    %6 = vector.broadcast %cst_5 : f32 to vector<16x128xf32>
    %7 = arith.mulf %5, %6 : vector<16x128xf32>
    %8 = math.erf %7 : vector<16x128xf32>
    %cst_6 = arith.constant 1.000000e+00 : f32
    %9 = vector.broadcast %cst_6 : f32 to vector<16x128xf32>
    %10 = arith.addf %9, %8 : vector<16x128xf32>
    %cst_7 = arith.constant 5.000000e-01 : f32
    %11 = vector.broadcast %cst_7 : f32 to vector<16x128xf32>
    %12 = arith.mulf %11, %10 : vector<16x128xf32>
    %13 = arith.mulf %12, %5 : vector<16x128xf32>
    %14 = arith.truncf %13 : vector<16x128xf32> to vector<16x128xbf16>
    %c0_8 = arith.constant 0 : index
    %c0_9 = arith.constant 0 : index
    %15 = vector.load %arg4[%c0_8, %c0_9] : memref<128x128xbf16, #tpu.memory_space<vmem>>, vector<128x128xbf16>
    %c0_10 = arith.constant 0 : index
    %c0_11 = arith.constant 0 : index
    %16 = vector.load %arg5[%c0_10, %c0_11] : memref<1x128xf32, #tpu.memory_space<vmem>>, vector<1x128xf32>
    %cst_12 = arith.constant dense<0.000000e+00> : vector<16x128xf32>
    %17 = tpu.matmul %14, %15, %cst_12 {dimension_numbers = #tpu.dot_dimension_numbers<[1], [0], [0], [1], [0, 0, 1, 1], [], []>} : vector<16x128xbf16>, vector<128x128xbf16>, vector<16x128xf32> -> vector<16x128xf32>
    %18 = vector.broadcast %16 : vector<1x128xf32> to vector<16x128xf32>
    %19 = arith.addf %17, %18 : vector<16x128xf32>
    %cst_13 = arith.constant 0.707106769 : f32
    %20 = vector.broadcast %cst_13 : f32 to vector<16x128xf32>
    %21 = arith.mulf %19, %20 : vector<16x128xf32>
    %22 = math.erf %21 : vector<16x128xf32>
    %cst_14 = arith.constant 1.000000e+00 : f32
    %23 = vector.broadcast %cst_14 : f32 to vector<16x128xf32>
    %24 = arith.addf %23, %22 : vector<16x128xf32>
    %cst_15 = arith.constant 5.000000e-01 : f32
    %25 = vector.broadcast %cst_15 : f32 to vector<16x128xf32>
    %26 = arith.mulf %25, %24 : vector<16x128xf32>
    %27 = arith.mulf %26, %19 : vector<16x128xf32>
    %28 = arith.truncf %27 : vector<16x128xf32> to vector<16x128xbf16>
    %c0_16 = arith.constant 0 : index
    %c0_17 = arith.constant 0 : index
    %29 = vector.load %arg6[%c0_16, %c0_17] : memref<128x32xbf16, #tpu.memory_space<vmem>>, vector<128x32xbf16>
    %c0_18 = arith.constant 0 : index
    %c0_19 = arith.constant 0 : index
    %30 = vector.load %arg7[%c0_18, %c0_19] : memref<1x32xf32, #tpu.memory_space<vmem>>, vector<1x32xf32>
    %cst_20 = arith.constant dense<0.000000e+00> : vector<16x32xf32>
    %31 = tpu.matmul %28, %29, %cst_20 {dimension_numbers = #tpu.dot_dimension_numbers<[1], [0], [0], [1], [0, 0, 1, 1], [], []>} : vector<16x128xbf16>, vector<128x32xbf16>, vector<16x32xf32> -> vector<16x32xf32>
    %32 = vector.broadcast %30 : vector<1x32xf32> to vector<16x32xf32>
    %33 = arith.addf %31, %32 : vector<16x32xf32>
    %c0_21 = arith.constant 0 : index
    %c0_22 = arith.constant 0 : index
    %34 = vector.load %arg8[%c0_21, %c0_22] : memref<16x32xf32, #tpu.memory_space<vmem>>, vector<16x32xf32>
    tpu.vector_store %arg8[%c0_21, %c0_22], %33 {strides = array<i32>} : memref<16x32xf32, #tpu.memory_space<vmem>>, vector<16x32xf32>,
    return
  }
  func.func @transform_0(%arg0: i32) -> (i32, i32) {
    %c0_i32 = arith.constant 0 : i32
    %c0_i32_0 = arith.constant 0 : i32
    return %arg0, %c0_i32 : i32, i32
  }
  func.func @transform_1(%arg0: i32) -> (i32, i32) {
    %c0_i32 = arith.constant 0 : i32
    %c0_i32_0 = arith.constant 0 : i32
    %c0_i32_1 = arith.constant 0 : i32
    return %c0_i32, %c0_i32_0 : i32, i32
  }
  func.func @transform_2(%arg0: i32) -> (i32, i32) {
    %c0_i32 = arith.constant 0 : i32
    %c0_i32_0 = arith.constant 0 : i32
    %c0_i32_1 = arith.constant 0 : i32
    return %c0_i32, %c0_i32_0 : i32, i32
  }
  func.func @transform_3(%arg0: i32) -> (i32, i32) {
    %c0_i32 = arith.constant 0 : i32
    %c0_i32_0 = arith.constant 0 : i32
    %c0_i32_1 = arith.constant 0 : i32
    return %c0_i32, %c0_i32_0 : i32, i32
  }
  func.func @transform_4(%arg0: i32) -> (i32, i32) {
    %c0_i32 = arith.constant 0 : i32
    %c0_i32_0 = arith.constant 0 : i32
    %c0_i32_1 = arith.constant 0 : i32
    return %c0_i32, %c0_i32_0 : i32, i32
  }
  func.func @transform_5(%arg0: i32) -> (i32, i32) {
    %c0_i32 = arith.constant 0 : i32
    %c0_i32_0 = arith.constant 0 : i32
    %c0_i32_1 = arith.constant 0 : i32
    return %c0_i32, %c0_i32_0 : i32, i32
  }
  func.func @transform_6(%arg0: i32) -> (i32, i32) {
    %c0_i32 = arith.constant 0 : i32
    %c0_i32_0 = arith.constant 0 : i32
    %c0_i32_1 = arith.constant 0 : i32
    return %c0_i32, %c0_i32_0 : i32, i32
  }
  func.func @transform_7(%arg0: i32) -> (i32, i32) {
    %c0_i32 = arith.constant 0 : i32
    %c0_i32_0 = arith.constant 0 : i32
    return %arg0, %c0_i32 : i32, i32
  }
}

</mosaic_0001>

<bundles_post_ra>
// kernel: tpu_custom_call.1
= control target key start
LH: loop header
LB: loop body
LE: loop exit
PB: predicated region body
PF: predicated region fallthrough
CT: control target
= control target key end

     0   :  { %12 = vsyncpa [#allocation3], 0  ;;  %s719_s0 = inlined_call_operand.hbm [shape: bf16[16,32], index: 0, kind: input, shape index: {}]   ;;  %s720_s1 = inlined_call_operand.vmem [shape: bf16[32,128], index: 1, kind: input, shape index: {}]   ;;  %s721_s2 = inlined_call_operand.vmem [shape: f32[1,128], index: 2, kind: input, shape index: {}]   ;;  %s722_s3 = inlined_call_operand.vmem [shape: bf16[128,128], index: 3, kind: input, shape index: {}]   ;;  %s723_s4 = inlined_call_operand.vmem [shape: f32[1,128], index: 4, kind: input, shape index: {}]   ;;  %s724_s5 = inlined_call_operand.vmem [shape: bf16[128,32], index: 5, kind: input, shape index: {}]   ;;  %s725_s6 = inlined_call_operand.vmem [shape: f32[1,32], index: 6, kind: input, shape index: {}]   ;;  %s726_s7 = inlined_call_operand.hbm [shape: f32[16,32], index: 7, kind: output, shape index: {}]  }
   0x1   :  { %13 = vsyncpa [#allocation4], 0  ;;  %s557_s24 = smov [#allocation2]   ;;  %s509_s28 = scalar_lea.hbm %s719_s0, 128 }
   0x2   :  { %s19_s25 = sshll.u32 %s557_s24, 4  ;;  %p510_p0 = scmp.ne.s32.totalorder %s719_s0, %s509_s28  ;;  %s20_s25 = int_to_ptr.vmem [resolvable:$true] %s19_s25 }
   0x3   :  { %p513_p1 = scmp.lt.u32.totalorder %s509_s28, %s719_s0 }
   0x5   :  { %p515_p2 = pnand %p513_p1, %p510_p0 }
   0x7   :  { %518 = shalt.err (!%p515_p2)
}
   0x8   :  { %s519_s10 = scalar_lea.vmem %s20_s25, 128  ;;  %p524_p4 = scmp.lt.s32.totalorder %s20_s25, %s20_s25 }
   0x9   :  { %p520_p3 = scmp.ne.s32.totalorder %s20_s25, %s519_s10  ;;  %p525_p5 = scmp.lt.s32.totalorder %s519_s10, %s519_s10 }
   0xb   :  { %p526_p6 = por %p525_p5, %p524_p4 }
   0xd   :  { %p527_p7 = pnand %p526_p6, %p520_p3 }
   0xf   :  { %530 = shalt.err (!%p527_p7)
}
  0x10   :  { %s558_s11 = smov 64   ;;  %s559_s12 = smov 4  }
  0x11   :  { %25 = dma.hbm_to_vmem [thread:$0]  %s719_s0, 128, %s20_s25, [#allocation3], %s558_s11, %s558_s11, %s559_s12  }
  0x12   :  { %553 = dma.done.wait [#allocation3], 128  }
  0x13   :  { %554 = vsyncadd [#allocation3], 4294967168  ;;  %v560_v0 = vmov 0.0   ;;  %vm561_vm0 = vmmov 0   ;;  %v482_v1 = vld [vmem:[%s720_s1] sm:$0xff]   ;;  %v483_v2 = vld [vmem:[%s720_s1 + $0x8] sm:$0xff]  }
  0x14   :  { %426 = vmatprep.subr.bf16.mxu0 %v560_v0  ;;  %430 = vmatprep.mubr.msk.bf16.mxu0 %vm561_vm0, %v560_v0  ;;  %v485_v3 = vld [vmem:[%s722_s3] sm:$0xff]   ;;  %vm72_vm1 = vcmask 261120   ;;  %v486_v5 = vld [vmem:[%s722_s3 + $0x8] sm:$0xff]   ;;  %v487_v6 = vld [vmem:[%s722_s3 + $0x10] sm:$0xff]   ;;  %s562_s26 = smov [#allocation5]  }
  0x15   :  { %434 = vmatprep.subr.bf16.mxu1 %v560_v0  ;;  %450 = vmatprep.mubr.msk.bf16.mxu1 %vm561_vm0, %v560_v0  ;;  %v484_v4 = vld [vmem:[#allocation2] sm:$0xff]   ;;  %v488_v7 = vld [vmem:[%s722_s3 + $0x18] sm:$0xff]   ;;  %v490_v9 = vld [vmem:[%s722_s3 + $0x28] sm:$0xff]   ;;  %s370_s27 = sshll.u32 %s562_s26, 4  ;;  %s371_s27 = int_to_ptr.vmem [resolvable:$true] %s370_s27 }
  0x16   :  { %427 = vmatpush3.bf16.msra.mxu0 %v482_v1  ;;  %435 = vmatpush3.bf16.msra.mxu1 %v485_v3  ;;  %v489_v8 = vld [vmem:[%s722_s3 + $0x20] sm:$0xff]   ;;  %v491_v10 = vld [vmem:[%s722_s3 + $0x30] sm:$0xff]   ;;  %v492_v11 = vld [vmem:[%s722_s3 + $0x38] sm:$0xff]   ;;  %s531_s28 = scalar_lea.vmem %s371_s27, 256  ;;  %p536_p9 = scmp.lt.s32.totalorder %s371_s27, %s371_s27 }
  0x17   :  { %428 = vmatprep.subr.bf16.mxu0 %v560_v0  ;;  %436 = vmatprep.subr.bf16.mxu1 %v560_v0  ;;  %v493_v12 = vld [vmem:[%s724_s5] sm:$0xff]   ;;  %v494_v13 = vld [vmem:[%s724_s5 + $0x8] sm:$0xff]   ;;  %v495_v32 = vld [vmem:[%s724_s5 + $0x10] sm:$0xff]   ;;  %p532_p8 = scmp.ne.s32.totalorder %s371_s27, %s531_s28  ;;  %p537_p10 = scmp.lt.s32.totalorder %s531_s28, %s531_s28 }
  0x18   :  { %v382_v14 = vld [vmem:[%s721_s2] ss:$0 sm:$0xff]  ;;  %v496_v33 = vld [vmem:[%s724_s5 + $0x18] sm:$0xff]   ;;  %v498_v35 = vld [vmem:[%s724_s5 + $0x28] sm:$0xff]  }
  0x19   :  { %v497_v34 = vld [vmem:[%s724_s5 + $0x20] sm:$0xff]   ;;  %v499_v36 = vld [vmem:[%s724_s5 + $0x30] sm:$0xff]   ;;  %v500_v37 = vld [vmem:[%s724_s5 + $0x38] sm:$0xff]   ;;  %p538_p11 = por %p537_p10, %p536_p9 }
  0x1a   :  { %429 = vmatpush3.bf16.msra.mxu0 %v483_v2  ;;  %437 = vmatpush3.bf16.msra.mxu1 %v486_v5  ;;  %v387_v38 = vld [vmem:[%s723_s4] ss:$0 sm:$0xff] }
  0x1b   :  { %454 = vmatprep.subr.bf16.mxu0 %v560_v0  ;;  %438 = vmatprep.subr.bf16.mxu1 %v560_v0  ;;  %v396_v56 = vld [vmem:[%s725_s6] ss:$0 sm:$0xff]  ;;  %p539_p12 = pnand %p538_p11, %p532_p8 }
  0x1d   :  { %431 = vmatmul.mubr.msk.bf16.vlgmr.msra.gmra.mrb[0].mxu0 %vm72_vm1, %v484_v4 }
  0x1e   :  { %470 = vmatprep.mubr.msk.bf16.mxu0 %vm561_vm0, %v560_v0  ;;  %439 = vmatpush3.bf16.msra.mxu1 %v487_v6 }
  0x1f   :  { %440 = vmatprep.subr.bf16.mxu1 %v560_v0  ;;  %455 = vmatpush3.bf16.msra.mxu0 %v493_v12 }
  0x20   :  { %456 = vmatprep.subr.bf16.mxu0 %v560_v0 }
  0x22   :  { %441 = vmatpush3.bf16.msra.mxu1 %v488_v7 }
  0x23   :  { %442 = vmatprep.subr.bf16.mxu1 %v560_v0  ;;  %457 = vmatpush3.bf16.msra.mxu0 %v494_v13 }
  0x24   :  { %458 = vmatprep.subr.bf16.mxu0 %v560_v0 }
  0x26   :  { %443 = vmatpush3.bf16.msra.mxu1 %v489_v8 }
  0x27   :  { %444 = vmatprep.subr.bf16.mxu1 %v560_v0  ;;  %459 = vmatpush3.bf16.msra.mxu0 %v495_v32 }
  0x28   :  { %460 = vmatprep.subr.bf16.mxu0 %v560_v0 }
  0x2a   :  { %445 = vmatpush3.bf16.msra.mxu1 %v490_v9 }
  0x2b   :  { %446 = vmatprep.subr.bf16.mxu1 %v560_v0  ;;  %461 = vmatpush3.bf16.msra.mxu0 %v496_v33 }
  0x2c   :  { %462 = vmatprep.subr.bf16.mxu0 %v560_v0 }
  0x2e   :  { %447 = vmatpush3.bf16.msra.mxu1 %v491_v10 }
  0x2f   :  { %448 = vmatprep.subr.bf16.mxu1 %v560_v0  ;;  %463 = vmatpush3.bf16.msra.mxu0 %v497_v34 }
  0x30   :  { %464 = vmatprep.subr.bf16.mxu0 %v560_v0 }
  0x32   :  { %449 = vmatpush3.bf16.msra.mxu1 %v492_v11 }
  0x33   :  { %465 = vmatpush3.bf16.msra.mxu0 %v498_v35 }
  0x34   :  { %466 = vmatprep.subr.bf16.mxu0 %v560_v0 }
  0x37   :  { %467 = vmatpush3.bf16.msra.mxu0 %v499_v36 }
  0x38   :  { %468 = vmatprep.subr.bf16.mxu0 %v560_v0 }
  0x3b   :  { %469 = vmatpush3.bf16.msra.mxu0 %v500_v37 }
  0xf0   :  { %v110_v15 = vpop.f32.mrb[0].mxu0 }
  0xf1   :  { %v111_v16 = vadd.f32 %v382_v14, %v110_v15  ;;  %v432_v17 = vpop.f32.mrb[1].mxu0 }
  0xf2   :  { %v113_v18 = vpop.f32.mrb[2].mxu0 }
  0xf3   :  { %v117_v19 = vmul.f32 0.70710677, %v111_v16  ;;  %v114_v20 = vadd.f32 %v382_v14, %v113_v18  ;;  %v433_v21 = vpop.f32.mrb[3].mxu0 }
  0xf5   :  { %501 = verf.f32 %v117_v19  ;;  %v118_v22 = vmul.f32 0.70710677, %v114_v20 }
  0xf7   :  { %503 = verf.f32 %v118_v22 }
  0xff   :  { %v502_v23 = vpop.eup %501 }
 0x100   :  { %v121_v24 = vadd.f32 1.0, %v502_v23 }
 0x101   :  { %v504_v25 = vpop.eup %503 }
 0x102   :  { %v123_v26 = vmul.f32 0.5, %v121_v24  ;;  %v122_v27 = vadd.f32 1.0, %v504_v25 }
 0x104   :  { %v124_v28 = vmul.f32 0.5, %v122_v27  ;;  %v125_v29 = vmul.f32 %v123_v26, %v111_v16 }
 0x106   :  { %v126_v30 = vmul.f32 %v124_v28, %v114_v20 }
 0x108   :  { %v127_v31 = vpack.c.bf16 %v126_v30, %v125_v29 }
 0x10a   :  { %451 = vmatmul.mubr.bf16.vlgmr.msra.gmra.mrb[0].mxu1 %v127_v31 }
 0x1dd   :  { %v233_v39 = vpop.f32.mrb[0].mxu1 }
 0x1de   :  { %v234_v40 = vadd.f32 %v387_v38, %v233_v39  ;;  %v452_v41 = vpop.f32.mrb[1].mxu1 }
 0x1df   :  { %v236_v42 = vpop.f32.mrb[2].mxu1 }
 0x1e0   :  { %v240_v43 = vmul.f32 0.70710677, %v234_v40  ;;  %v237_v44 = vadd.f32 %v387_v38, %v236_v42  ;;  %v453_v45 = vpop.f32.mrb[3].mxu1 }
 0x1e2   :  { %505 = verf.f32 %v240_v43  ;;  %v241_v46 = vmul.f32 0.70710677, %v237_v44 }
 0x1e4   :  { %507 = verf.f32 %v241_v46 }
 0x1ec   :  { %v506_v47 = vpop.eup %505 }
 0x1ed   :  { %v244_v48 = vadd.f32 1.0, %v506_v47 }
 0x1ee   :  { %v508_v49 = vpop.eup %507 }
 0x1ef   :  { %v246_v50 = vmul.f32 0.5, %v244_v48  ;;  %v245_v51 = vadd.f32 1.0, %v508_v49 }
 0x1f1   :  { %v247_v52 = vmul.f32 0.5, %v245_v51  ;;  %v248_v53 = vmul.f32 %v246_v50, %v234_v40 }
 0x1f3   :  { %v249_v54 = vmul.f32 %v247_v52, %v237_v44 }
 0x1f5   :  { %v250_v55 = vpack.c.bf16 %v249_v54, %v248_v53 }
 0x1f7   :  { %471 = vmatmul.mubr.bf16.vlgmr.msra.gmra.mrb[4].mxu0 %v250_v55 }
 0x2ca   :  { %v356_v57 = vpop.f32.mrb[4].mxu0 }
 0x2cb   :  { %v357_v58 = vadd.f32 %v396_v56, %v356_v57  ;;  %v472_v59 = vpop.f32.mrb[5].mxu0 }
 0x2cc   :  { %v359_v60 = vpop.f32.mrb[6].mxu0 }
 0x2cd   :  { %363 = vst.msk [vmem:[#allocation5] sm:$0xff] %vm72_vm1, %v357_v58  ;;  %v360_v61 = vadd.f32 %v396_v56, %v359_v60  ;;  %v473_v62 = vpop.f32.mrb[7].mxu0 }
 0x2cf   :  { %364 = vst.msk [vmem:[#allocation5 + $0x8] sm:$0xff] %vm72_vm1, %v360_v61 }
 0x2d0   :  { %542 = shalt.err (!%p539_p12)
}
 0x2d1   :  { %s543_s30 = scalar_lea.hbm %s726_s7, 256 }
 0x2d2   :  { %p544_p13 = scmp.ne.s32.totalorder %s726_s7, %s543_s30  ;;  %p547_p0 = scmp.lt.u32.totalorder %s543_s30, %s726_s7 }
 0x2d4   :  { %p549_p1 = pnand %p547_p0, %p544_p13 }
 0x2d6   :  { %552 = shalt.err (!%p549_p1)
}
 0x2d7   :  { %s563_s12 = smov 128   ;;  %s564_s13 = smov 8  }
 0x2d8   :  { %376 = dma.vmem_to_hbm [thread:$0]  %s371_s27, 256, %s726_s7, [#allocation4], %s563_s12, %s563_s12, %s564_s13  }
 0x2d9   :  { %555 = dma.done.wait [#allocation4], 256  }
 0x2da   :  { %556 = vsyncadd [#allocation4], 4294967040 }
 0x2db   :  { %380 = vsyncpa [#allocation3], 1 }
 0x2dc   :  { %381 = vsyncpa [#allocation4], 1 }

</bundles_post_ra>
